<compile_context>
chip_gen: v5e
topology: v5e:2x2
jax: 0.10.0
libtpu: 0.0.40
codegen_flags: <defaults>
</compile_context>

<pallas_src>
import jax
import jax.numpy as jnp
from jax.experimental import pallas as pl
from jax.experimental.pallas import tpu as pltpu

_LANES = 128    # lane width of one vreg
_ACC_ROWS = 64  # accumulator sublane rows (8 vregs -> 8 independent add chains)
_NCORES = 2     # leading 'parallel' grid axis (megacore split on v7x)


def _rmse_partial_kernel(yhat_ref, tgt_ref, out_ref, acc_ref):
    # yhat_ref / tgt_ref: (tr, 128) tiles of the flattened, zero-padded inputs.
    # acc_ref: (ACC_ROWS, 128) f32 resident per-core partial sums.
    # out_ref: (1, ACC_ROWS, 128) per-core partial-sum output block.
    i = pl.program_id(1)

    @pl.when(i == 0)
    def _():
        acc_ref[...] = jnp.zeros_like(acc_ref)

    d = yhat_ref[...].astype(jnp.float32) - tgt_ref[...].astype(jnp.float32)
    sq = d * d                                             # (tr, 128)
    # Fold onto the (ACC_ROWS, 128) accumulator.  The reshape only splits the
    # leading dim (trailing (8,128) tiles stay intact -> no relayout) and the
    # ACC_ROWS/8 = 8 independent accumulator vregs keep this pure-VPU work
    # hidden under the input DMA.
    acc_ref[...] += jnp.sum(sq.reshape(-1, _ACC_ROWS, _LANES), axis=0)

    @pl.when(i == pl.num_programs(1) - 1)
    def _():
        out_ref[0] = acc_ref[...]


def rmse_downsample(yhat, y, input_size, lstms_shape=3, eps=1e-6,
                    *, tile_rows=8192):
    """yhat: (T, B, L, L);  y: (B, 1, T, H, W) with H = W = input_size."""
    stride = input_size // lstms_shape
    start = stride // 2

    T, B, L, L2 = yhat.shape
    assert L == lstms_shape and L2 == lstms_shape

    # --- center selection hoisted into the wrapper (== SelectCenter applied
    # to squeeze(y,1).permute(1,0,2,3)).  Two-step slice: first the center
    # rows (contiguous last dim -> full-burst reads), then the center columns
    # of the already-small (B, T, L, W) tensor. ---
    rows_sel = y[:, 0, :, start::stride, :][:, :, :L, :]         # (B, T, L, W)
    tgt = rows_sel[:, :, :, start::stride][:, :, :, :L]          # (B, T, L, L)
    tgt = jnp.transpose(tgt, (1, 0, 2, 3))                       # (T, B, L, L)

    # --- lane-dense 2D view of both operands: flatten, minimal zero pad
    # (pads cancel in the diff), reshape to (padded_rows, 128). ---
    n = T * B * L * L
    rows = -(-n // _LANES)                                       # ceil(n/128)

    # Fix the number of grid steps first, then size the tile so the grid
    # divides evenly: pad stays tiny instead of up to a whole tile of zeros.
    steps = max(1, -(-rows // int(tile_rows)))
    steps = -(-steps // _NCORES) * _NCORES                       # multiple of NCORES
    tr = _ACC_ROWS * (-(-rows // (_ACC_ROWS * steps)))           # multiple of 64
    padded_rows = tr * steps
    steps_per_core = steps // _NCORES
    pad = padded_rows * _LANES - n

    # TODO(synk): the pad+reshape materializes one extra copy of each operand;
    # for very large T*B a manual ragged-tail DMA path (memory_space=pl.ANY)
    # would remove it, but yhat/target are small so it is not the bottleneck.
    yhat_2d = jnp.pad(yhat.reshape(-1), (0, pad)).reshape(padded_rows, _LANES)
    tgt_2d = jnp.pad(tgt.reshape(-1), (0, pad)).reshape(padded_rows, _LANES)

    itemsize = jnp.dtype(yhat.dtype).itemsize
    cost = pl.CostEstimate(
        flops=3 * padded_rows * _LANES,
        transcendentals=0,
        bytes_accessed=2 * padded_rows * _LANES * itemsize
        + _NCORES * _ACC_ROWS * _LANES * 4)

    partials = pl.pallas_call(
        _rmse_partial_kernel,
        out_shape=jax.ShapeDtypeStruct((_NCORES, _ACC_ROWS, _LANES),
                                       jnp.float32),
        grid_spec=pltpu.PrefetchScalarGridSpec(
            num_scalar_prefetch=0,
            grid=(_NCORES, steps_per_core),
            in_specs=[
                pl.BlockSpec((tr, _LANES),
                             lambda p, i: (p * steps_per_core + i, 0)),
                pl.BlockSpec((tr, _LANES),
                             lambda p, i: (p * steps_per_core + i, 0)),
            ],
            out_specs=pl.BlockSpec((1, _ACC_ROWS, _LANES),
                                   lambda p, i: (p, 0, 0)),
            scratch_shapes=[pltpu.VMEM((_ACC_ROWS, _LANES), jnp.float32)]),
        compiler_params=pltpu.CompilerParams(
            dimension_semantics=("parallel", "arbitrary"),
            vmem_limit_bytes=32 << 20),
        cost_estimate=cost,
    )(yhat_2d, tgt_2d)

    # Finalize in the wrapper: sum both per-core partial blocks (zero padding
    # contributes nothing), divide by the true element count, add eps, sqrt.
    return jnp.sqrt(jnp.sum(partials) / float(n) + float(eps))


def rmse_downsample_ref(yhat, y, input_size, lstms_shape=3, eps=1e-6):
    """Pure-JAX reference mirroring the PyTorch forward."""
    stride = input_size // lstms_shape
    start = stride // 2
    t = jnp.transpose(jnp.squeeze(y, axis=1), (1, 0, 2, 3))          # (T,B,H,W)
    t = t[:, :, start::stride, start::stride][:, :, :lstms_shape, :lstms_shape]
    return jnp.sqrt(jnp.mean((yhat - t) ** 2) + eps)


if __name__ == "__main__":
    key = jax.random.PRNGKey(0)
    k1, k2, k3, k4 = jax.random.split(key, 4)

    # Case 1: small shapes, one step per core.
    B, T, input_size, L = 2, 4, 12, 3   # stride = 4, centers at [2, 6, 10]
    yhat = jax.random.normal(k1, (T, B, L, L), dtype=jnp.float32)
    y = jax.random.normal(k2, (B, 1, T, input_size, input_size),
                          dtype=jnp.float32)
    loss = jax.block_until_ready(rmse_downsample(yhat, y, input_size, L))
    ref = rmse_downsample_ref(yhat, y, input_size, L)
    assert jnp.allclose(loss, ref, atol=1e-5, rtol=1e-5), (loss, ref)

    # Case 2: force a multi-step grid per core to exercise init/accumulate/
    # finalize and the two-core partial-sum path.
    B2, T2 = 32, 128
    yhat2 = jax.random.normal(k3, (T2, B2, L, L), dtype=jnp.float32)
    y2 = jax.random.normal(k4, (B2, 1, T2, input_size, input_size),
                           dtype=jnp.float32)
    loss2 = jax.block_until_ready(
        rmse_downsample(yhat2, y2, input_size, L, tile_rows=64))
    ref2 = rmse_downsample_ref(yhat2, y2, input_size, L)
    assert jnp.allclose(loss2, ref2, atol=1e-5, rtol=1e-5), (loss2, ref2)

    print("KERNEL_OK")
</pallas_src>

<mosaic_0001>
module attributes {stable_mosaic.version = 11 : i64} {
  func.func @_rmse_partial_kernel(%arg0: i32, %arg1: i32, %arg2: memref<64x128xf32, #tpu.memory_space<vmem>>, %arg3: memref<64x128xf32, #tpu.memory_space<vmem>>, %arg4: memref<1x64x128xf32, #tpu.memory_space<vmem>>, %arg5: memref<64x128xf32, #tpu.memory_space<vmem>>) attributes {dimension_semantics = [#tpu.dimension_semantics<parallel>, #tpu.dimension_semantics<arbitrary>], iteration_bounds = array<i64: 2, 1>, scalar_prefetch = 0 : i64, scratch_operands = 1 : i64, tpu.core_type = #tpu.core_type<tc>, window_params = [{transform_indices = @transform_0, window_bounds = array<i64: 64, 128>}, {transform_indices = @transform_1, window_bounds = array<i64: 64, 128>}, {transform_indices = @transform_2, window_bounds = array<i64: 1, 64, 128>}]} {
    %c0_i32 = arith.constant 0 : i32
    %0 = arith.cmpi eq, %arg1, %c0_i32 : i32
    %1 = arith.extui %0 : i1 to i32
    %c0_i32_0 = arith.constant 0 : i32
    %2 = arith.cmpi ne, %1, %c0_i32_0 : i32
    scf.if %2 {
      %cst_10 = arith.constant 0.000000e+00 : f32
      %15 = vector.broadcast %cst_10 : f32 to vector<64x128xf32>
      %c0_11 = arith.constant 0 : index
      %c0_12 = arith.constant 0 : index
      %16 = vector.load %arg5[%c0_11, %c0_12] : memref<64x128xf32, #tpu.memory_space<vmem>>, vector<64x128xf32>
      tpu.vector_store %arg5[%c0_11, %c0_12], %15 {strides = array<i32>} : memref<64x128xf32, #tpu.memory_space<vmem>>, vector<64x128xf32>,
    } else {
    }
    %c0 = arith.constant 0 : index
    %c0_1 = arith.constant 0 : index
    %3 = vector.load %arg2[%c0, %c0_1] : memref<64x128xf32, #tpu.memory_space<vmem>>, vector<64x128xf32>
    %c0_2 = arith.constant 0 : index
    %c0_3 = arith.constant 0 : index
    %4 = vector.load %arg3[%c0_2, %c0_3] : memref<64x128xf32, #tpu.memory_space<vmem>>, vector<64x128xf32>
    %5 = arith.subf %3, %4 : vector<64x128xf32>
    %6 = arith.mulf %5, %5 : vector<64x128xf32>
    %c0_4 = arith.constant 0 : index
    %c0_5 = arith.constant 0 : index
    %7 = vector.load %arg5[%c0_4, %c0_5] : memref<64x128xf32, #tpu.memory_space<vmem>>, vector<64x128xf32>
    %8 = vector.shape_cast %6 : vector<64x128xf32> to vector<1x64x128xf32>
    %cst = arith.constant dense<0.000000e+00> : vector<64x128xf32>
    %9 = vector.multi_reduction <add>, %8, %cst [0] : vector<1x64x128xf32> to vector<64x128xf32>
    %10 = arith.addf %7, %9 : vector<64x128xf32>
    %c0_6 = arith.constant 0 : index
    %c0_7 = arith.constant 0 : index
    %11 = vector.load %arg5[%c0_6, %c0_7] : memref<64x128xf32, #tpu.memory_space<vmem>>, vector<64x128xf32>
    tpu.vector_store %arg5[%c0_6, %c0_7], %10 {strides = array<i32>} : memref<64x128xf32, #tpu.memory_space<vmem>>, vector<64x128xf32>,
    %c0_i32_8 = arith.constant 0 : i32
    %12 = arith.cmpi eq, %arg1, %c0_i32_8 : i32
    %13 = arith.extui %12 : i1 to i32
    %c0_i32_9 = arith.constant 0 : i32
    %14 = arith.cmpi ne, %13, %c0_i32_9 : i32
    scf.if %14 {
      %c0_10 = arith.constant 0 : index
      %c0_11 = arith.constant 0 : index
      %15 = vector.load %arg5[%c0_10, %c0_11] : memref<64x128xf32, #tpu.memory_space<vmem>>, vector<64x128xf32>
      %c0_12 = arith.constant 0 : index
      %c0_13 = arith.constant 0 : index
      %c0_14 = arith.constant 0 : index
      %16 = vector.load %arg4[%c0_12, %c0_13, %c0_14] : memref<1x64x128xf32, #tpu.memory_space<vmem>>, vector<1x64x128xf32>
      %17 = vector.shape_cast %16 : vector<1x64x128xf32> to vector<64x128xf32>
      %18 = vector.shape_cast %15 : vector<64x128xf32> to vector<1x64x128xf32>
      tpu.vector_store %arg4[%c0_12, %c0_13, %c0_14], %18 {strides = array<i32>} : memref<1x64x128xf32, #tpu.memory_space<vmem>>, vector<1x64x128xf32>,
    } else {
    }
    return
  }
  func.func @transform_0(%arg0: i32, %arg1: i32) -> (i32, i32) {
    %c1_i32 = arith.constant 1 : i32
    %0 = arith.muli %arg0, %c1_i32 : i32
    %1 = arith.addi %0, %arg1 : i32
    %c0_i32 = arith.constant 0 : i32
    %c0_i32_0 = arith.constant 0 : i32
    return %1, %c0_i32 : i32, i32
  }
  func.func @transform_1(%arg0: i32, %arg1: i32) -> (i32, i32) {
    %c1_i32 = arith.constant 1 : i32
    %0 = arith.muli %arg0, %c1_i32 : i32
    %1 = arith.addi %0, %arg1 : i32
    %c0_i32 = arith.constant 0 : i32
    %c0_i32_0 = arith.constant 0 : i32
    return %1, %c0_i32 : i32, i32
  }
  func.func @transform_2(%arg0: i32, %arg1: i32) -> (i32, i32, i32) {
    %c0_i32 = arith.constant 0 : i32
    %c0_i32_0 = arith.constant 0 : i32
    %c0_i32_1 = arith.constant 0 : i32
    return %arg0, %c0_i32, %c0_i32_0 : i32, i32, i32
  }
}

</mosaic_0001>

<bundles_post_ra>
// kernel: tpu_custom_call.1
= control target key start
LH: loop header
LB: loop body
LE: loop exit
PB: predicated region body
PF: predicated region fallthrough
CT: control target
= control target key end

     0   :  { %7 = vsyncpa [#allocation4], 0  ;;  %s871_s0 = inlined_call_operand.hbm [shape: f32[128,128], index: 0, kind: input, shape index: {}]   ;;  %s872_s1 = inlined_call_operand.hbm [shape: f32[128,128], index: 1, kind: input, shape index: {}]   ;;  %s873_s2 = inlined_call_operand.hbm [shape: f32[2,64,128], index: 2, kind: output, shape index: {}]  }
   0x1   :  { %9 = vsyncpa [#allocation4 + $0x1], 0 }
   0x2   :  { %10 = vsyncpa [#allocation7], 0 }
   0x3   :  { %12 = vsyncpa [#allocation7 + $0x1], 0 }
   0x4   :  { %13 = vsyncpa [#allocation5], 0 }
   0x5   :  { %15 = vsyncpa [#allocation5 + $0x1], 0  ;;  %s705_s9 = smov 0   ;;  %s707_s10 = smov 0  }
   0x6   :  { %s709_s11 = smov 0   ;;  %s711_s12 = smov 0  }
   0x7   :  { %s713_s13 = smov 0   ;;  %s715_s14 = smov 0  }
   0x8 LB: > { %s445_s15 = sadd.s32 4294967295, %s684_s14   ;;  %s446_s16 = sadd.s32 4294967294, %s684_s14   ;;  %s684_s14 = sphi %s715_s14, %s21_s14   ;;  %s680_s13 = sphi %s713_s13, %s883_s13   ;;  %s676_s12 = sphi %s711_s12, %s882_s12   ;;  %s672_s11 = sphi %s709_s11, %s881_s11   ;;  %s668_s10 = sphi %s707_s10, %s880_s10   ;;  %s664_s9 = sphi %s705_s9, %s879_s9  }
   0x9   : > { %s33_s17 = sadd.s32 1, %s680_s13  ;;  %s42_s18 = sadd.s32 1, %s672_s11 }
   0xa   : > { %p35_p0 = scmp.ge.s32.totalorder %s33_s17, 2  ;;  %p49_p1 = scmp.ne.s32.totalorder %s672_s11, %s668_s10 }
   0xb   : > { %p50_p2 = scmp.eq.s32.totalorder %s684_s14, 0  ;;  %p55_p3 = scmp.ne.s32.totalorder %s668_s10, %s664_s9 }
   0xc   : > { %s885_s17 = smov (%p35_p0, %s33_s17), 0  ;;  %p56_p5 = scmp.eq.s32.totalorder %s445_s15, 0 }
   0xd   : > { %p746_p4 = por %p50_p2, %p49_p1  ;;  %s39_s20 = ssub.s32 %s680_s13, %s885_s17 }
   0xe   : > { %p107_p6 = scmp.eq.s32.totalorder %s445_s15, 1  ;;  %p40_p7 = scmp.eq.s32.totalorder %s39_s20, 0 }
   0xf   : > { %p752_p8 = por %p56_p5, %p55_p3  ;;  %p113_p10 = scmp.eq.s32.totalorder %s446_s16, 1 }
  0x10   : > { %p756_p9 = por %p107_p6, %p49_p1  ;;  %p448_p12 = scmp.ge.s32.totalorder %s684_s14, 2 }
  0x11   : > { %s761_s23 = scalar_select %p40_p7, %s672_s11, %s42_s18  }
  0x12   : > { %p763_p11 = por %p113_p10, %p55_p3  ;;  %p484_p13 = scmp.lt.s32.totalorder %s684_s14, 2 }
  0x13   : > { %s770_s25 = sand.u32 1, %s672_s11   ;;  %s464_s27 = sshll.u32 %s680_s13, 6 }
  0x14   : > { %s449_s26 = sshll.u32 %s770_s25, 6  ;;  %s143_s30 = scalar_lea.hbm %s871_s0, %s464_s27 }
  0x15   : > { %s137_s3 = scalar_lea.vmem [#allocation3], %s449_s26  ;;  %s144_s5 = sshll.u32 %s143_s30, 4  ;;  %s145_s5 = int_to_ptr.hbm [resolvable:$true] %s144_s5 }
  0x16   : > { %s146_s4 = sshll.u32 %s137_s3, 4  ;;  %p779_p0 = pnand %p484_p13, %p746_p4  ;;  %s147_s4 = int_to_ptr.vmem [resolvable:$true] %s146_s4 }
  0x17   : > { %p455_p1 = scmp.ge.s32.totalorder %s684_s14, 1  ;;  %s134_s7 = scalar_lea.sflag [#allocation4], %s770_s25 }
  0x18   : > { %s686_s8 = smov 128   ;;  %s687_s15 = smov 8  }
  0x19   : > { %476 = dma.hbm_to_vmem [thread:$0]  (!%p779_p0), %s145_s5, 1024, %s147_s4, %s134_s7, %s686_s8, %s686_s8, %s687_s15  }
  0x1a   : > { %p177_p2 = scmp.lt.s32.totalorder %s684_s14, 3  ;;  %s166_s20 = scalar_lea.hbm %s872_s1, %s464_s27 }
  0x1b   : > { %s167_s28 = sshll.u32 %s166_s20, 4  ;;  %s160_s19 = scalar_lea.vmem [#allocation6], %s449_s26  ;;  %s168_s28 = int_to_ptr.hbm [resolvable:$true] %s167_s28 }
  0x1c   : > { %p178_p3 = pnand %p455_p1, %p177_p2  ;;  %s169_s29 = sshll.u32 %s160_s19, 4  ;;  %s170_s29 = int_to_ptr.vmem [resolvable:$true] %s169_s29 }
  0x1d   : > { %s157_s30 = scalar_lea.sflag [#allocation7], %s770_s25  ;;  %s795_s3 = sand.u32 (!%p178_p3), 1, %s668_s10  }
  0x1e   : > { %479 = dma.hbm_to_vmem [thread:$0]  (!%p779_p0), %s168_s28, 1024, %s170_s29, %s157_s30, %s686_s8, %s686_s8, %s687_s15  }
  0x1f   : > { %181 = sbr.rel (%p178_p3) target bundleno = 56 (0x38), region = 28  ;;  %s798_s4 = sshll.u32 (!%p178_p3), %s795_s3, 6 }
  0x20   : > { %s184_s27 = scalar_lea.sflag (!%p178_p3), [#allocation4], %s795_s3  ;;  %s802_s5 = scalar_lea.vmem (!%p178_p3), [#allocation3], %s798_s4 }
  0x24   : > { %651 = dma.done.wait (%p752_p8), %s184_s27, 1024  }
  0x25   : > { %653 = vsyncadd (%p752_p8), %s184_s27, 4294966272  ;;  %s194_s25 = scalar_lea.sflag [#allocation7], %s795_s3  ;;  %s810_s26 = scalar_lea.vmem [#allocation6], %s798_s4 }
  0x26   : > { %655 = dma.done.wait (%p752_p8), %s194_s25, 1024  }
  0x27   : > { %657 = vsyncadd (%p752_p8), %s194_s25, 4294966272  ;;  %v240_v0 = vld [vmem:[%s802_s5] sm:$0xff]  ;;  %v241_v2 = vld [vmem:[%s802_s5 + $0x8] sm:$0xff]  ;;  %s466_s21 = sshll.u32 %s676_s12, 6  ;;  %s223_s8 = scalar_lea.vmem [#allocation8], %s798_s4 }
  0x28   : > { %v248_v1 = vld [vmem:[%s810_s26] sm:$0xff]  ;;  %v249_v4 = vld [vmem:[%s810_s26 + $0x8] sm:$0xff]  ;;  %v242_v5 = vld [vmem:[%s802_s5 + $0x10] sm:$0xff]  ;;  %s335_s7 = scalar_lea.hbm %s873_s2, %s466_s21  ;;  %s336_s15 = sshll.u32 %s223_s8, 4  ;;  %s337_s15 = int_to_ptr.vmem [resolvable:$true] %s336_s15 }
  0x29   : > { %v256_v3 = vsub.f32 %v240_v0, %v248_v1  ;;  %v250_v6 = vld [vmem:[%s810_s26 + $0x10] sm:$0xff]  ;;  %v257_v7 = vsub.f32 %v241_v2, %v249_v4  ;;  %v243_v9 = vld [vmem:[%s802_s5 + $0x18] sm:$0xff]  ;;  %v244_v11 = vld [vmem:[%s802_s5 + $0x20] sm:$0xff]  ;;  %s338_s16 = sshll.u32 %s335_s7, 4  ;;  %s324_s18 = scalar_lea.sflag [#allocation5], %s795_s3  ;;  %s339_s16 = int_to_ptr.hbm [resolvable:$true] %s338_s16 }
  0x2a   : > { %v258_v8 = vsub.f32 %v242_v5, %v250_v6  ;;  %v251_v10 = vld [vmem:[%s810_s26 + $0x18] sm:$0xff]  ;;  %v252_v14 = vld [vmem:[%s810_s26 + $0x20] sm:$0xff]  ;;  %v245_v15 = vld [vmem:[%s802_s5 + $0x28] sm:$0xff]  ;;  %s612_s20 = sshra.s32 %s339_s16, 4  ;;  %s618_s30 = scalar_lea.hbm %s873_s2, 128  ;;  %s613_s20 = int_to_ptr.hbm [resolvable:$true] %s612_s20 }
  0x2b   : > { %v264_v12 = vmul.f32 %v256_v3, %v256_v3  ;;  %v259_v13 = vsub.f32 %v243_v9, %v251_v10  ;;  %v253_v16 = vld [vmem:[%s810_s26 + $0x28] sm:$0xff]  ;;  %v265_v17 = vmul.f32 %v257_v7, %v257_v7  ;;  %v260_v19 = vsub.f32 %v244_v11, %v252_v14  ;;  %v246_v21 = vld [vmem:[%s802_s5 + $0x30] sm:$0xff]  ;;  %v247_v23 = vld [vmem:[%s802_s5 + $0x38] sm:$0xff]  ;;  %s614_s28 = scalar_lea.hbm %s613_s20, 64  ;;  %p619_p7 = scmp.lt.s32.totalorder %s613_s20, %s873_s2 }
  0x2c   : > { %v266_v18 = vmul.f32 %v258_v8, %v258_v8  ;;  %v261_v20 = vsub.f32 %v245_v15, %v253_v16  ;;  %v254_v22 = vld [vmem:[%s810_s26 + $0x30] sm:$0xff]  ;;  %v255_v26 = vld [vmem:[%s810_s26 + $0x38] sm:$0xff]  ;;  %p615_p4 = scmp.ne.s32.totalorder %s613_s20, %s614_s28  ;;  %p620_p8 = scmp.lt.s32.totalorder %s618_s30, %s614_s28 }
  0x2d   : > { %315 = vst [vmem:[%s223_s8] sm:$0xff] %v264_v12  ;;  %v267_v24 = vmul.f32 %v259_v13, %v259_v13  ;;  %v262_v25 = vsub.f32 %v246_v21, %v254_v22  ;;  %v268_v27 = vmul.f32 %v260_v19, %v260_v19  ;;  %v263_v29 = vsub.f32 %v247_v23, %v255_v26 }
  0x2e   : > { %316 = vst [vmem:[%s223_s8 + $0x8] sm:$0xff] %v265_v17  ;;  %v269_v28 = vmul.f32 %v261_v20, %v261_v20  ;;  %p616_p5 = pnand %p615_p4, %p756_p9  ;;  %p621_p10 = por %p620_p8, %p619_p7 }
  0x2f   : > { %317 = vst [vmem:[%s223_s8 + $0x10] sm:$0xff] %v266_v18  ;;  %v270_v30 = vmul.f32 %v262_v25, %v262_v25  ;;  %v271_v31 = vmul.f32 %v263_v29, %v263_v29 }
  0x30   : > { %318 = vst [vmem:[%s223_s8 + $0x18] sm:$0xff] %v267_v24  ;;  %p617_p6 = pneg %p616_p5 }
  0x31   : > { %319 = vst [vmem:[%s223_s8 + $0x20] sm:$0xff] %v268_v27 }
  0x32   : > { %320 = vst [vmem:[%s223_s8 + $0x28] sm:$0xff] %v269_v28  ;;  %p622_p13 = pnand %p621_p10, %p617_p6 }
  0x33   : > { %321 = vst [vmem:[%s223_s8 + $0x30] sm:$0xff] %v270_v30 }
  0x34   : > { %322 = vst [vmem:[%s223_s8 + $0x38] sm:$0xff] %v271_v31 }
  0x35   : > { %625 = shalt.err (!%p622_p13)
}
  0x36   : > { %s688_s3 = smov 128   ;;  %s689_s5 = smov 8  }
  0x37   : > { %471 = dma.vmem_to_hbm [thread:$0]  (%p756_p9), %s337_s15, 1024, %s339_s16, %s324_s18, %s688_s3, %s688_s3, %s689_s5  }
  0x38 PF: > { %s353_s25 = sand.u32 1, %s664_s9   ;;  %p481_p0 = pnand %p448_p12, %p763_p11 }
  0x39   : > { %s354_s26 = scalar_lea.sflag [#allocation5], %s353_s25 }
  0x3a   : > { %p482_p1 = pneg %p481_p0 }
  0x3c   : > { %659 = dma.done.wait (%p482_p1), %s354_s26, 1024  }
  0x3d   : > { %661 = vsyncadd (%p482_p1), %s354_s26, 4294966272  ;;  %s21_s14 = sadd.s32 1, %s684_s14   ;;  %s879_s9 = smov %s668_s10 }
  0x3e   : > { %p18_p2 = scmp.ge.s32.totalorder %s21_s14, 4   ;;  %s880_s10 = smov %s672_s11 }
  0x3f   : > { %s881_s11 = smov %s761_s23  ;;  %s882_s12 = smov %s680_s13 }
  0x40   : > { %s883_s13 = smov %s885_s17  ;;  %20 = sbr.rel (!%p18_p2) target bundleno = 8 (0x8), region = 94 }
  0x45   :  { %360 = vsyncpa [#allocation4], 1 }
  0x46   :  { %362 = vsyncpa [#allocation4 + $0x1], 1 }
  0x47   :  { %363 = vsyncpa [#allocation7], 1 }
  0x48   :  { %365 = vsyncpa [#allocation7 + $0x1], 1 }
  0x49   :  { %366 = vsyncpa [#allocation5], 1 }
  0x4a   :  { %368 = vsyncpa [#allocation5 + $0x1], 1 }

</bundles_post_ra>
